<compile_context>
chip_gen: v7x
topology: tpu7x:2x2x1
jax: 0.10.0
libtpu: 0.0.40
codegen_flags: <defaults>
</compile_context>

<pallas_src>
import functools

import jax
import jax.numpy as jnp
from jax.experimental import pallas as pl
from jax.experimental.pallas import tpu as pltpu

LANES = 128
MAX_BLOCK_ROWS = 8192  # 8192 * 128 * 4 B = 4 MiB per f32 input block
EPS = 1e-5


def _bce_loss(x, y):
    # -(y*log(x+eps) + (1-y)*log(1-x+eps))  ==  -(l1x + y*(lx - l1x))
    # (saves one subtract and one multiply per vreg; (1+eps) folds to a constant)
    lx = jnp.log(x + EPS)
    l1x = jnp.log((1.0 + EPS) - x)
    return -(l1x + y * (lx - l1x))


def _occ_loss_kernel(occ_ref, lab_ref, out_ref, *, steps, total_blocks, groups,
                     valid_rows_in_last, has_overhang):
    p = pl.program_id(0)
    s = pl.program_id(1)

    # Zero the per-chunk resident accumulator at the start of each chunk.
    @pl.when(s == 0)
    def _():
        out_ref[...] = jnp.zeros_like(out_ref)

    # Cast in VMEM (no-op for f32 inputs; halves HBM traffic for bf16 inputs).
    x = occ_ref[...].astype(jnp.float32)
    y = lab_ref[...].astype(jnp.float32)
    loss = _bce_loss(x, y)

    def full_acc():
        out_ref[...] += jnp.sum(loss.reshape(groups, 8, LANES), axis=0)

    def masked_acc():
        # Only the last real block can contain Pallas block-padding rows; mask
        # with a select (NOT a mul-by-0) so garbage log() values never propagate.
        row = jax.lax.broadcasted_iota(jnp.int32, loss.shape, 0)
        masked = jnp.where(row < valid_rows_in_last, loss, 0.0)
        out_ref[...] += jnp.sum(masked.reshape(groups, 8, LANES), axis=0)

    if valid_rows_in_last is None and not has_overhang:
        # Every block is full and every step is real: straight-line accumulate.
        full_acc()
    else:
        g = p * steps + s          # global block index (may overshoot by one)
        last = total_blocks - 1

        @pl.when(g < last)
        def _():
            full_acc()

        @pl.when(g == last)
        def _():
            if valid_rows_in_last is None:
                full_acc()
            else:
                masked_acc()
        # g > last: overhang step of the last chunk (index clamped in the
        # index_map) contributes nothing.


def occupancy_loss_2(occ_ori, occup_labels_2, weight):
    """Pallas implementation of Occupancy_loss_2.forward. Returns an f32 scalar."""
    assert occ_ori.shape == occup_labels_2.shape
    n = int(occ_ori.size)

    flat_occ = occ_ori.reshape(-1)
    flat_lab = occup_labels_2.reshape(-1)

    n_aligned = (n // LANES) * LANES
    rows = n_aligned // LANES

    total = jnp.float32(0.0)

    if rows > 0:
        # Free reshape of the contiguous prefix into a lane-dense (rows, 128) view.
        occ2d = flat_occ[:n_aligned].reshape(rows, LANES)
        lab2d = flat_lab[:n_aligned].reshape(rows, LANES)

        block_rows = min(MAX_BLOCK_ROWS, ((rows + 7) // 8) * 8)
        total_blocks = pl.cdiv(rows, block_rows)

        # Unconditional 2-way chunk split so both v7x TensorCores run whenever
        # there are >= 2 blocks of work; harmless (sequential) on single-TC chips.
        num_chunks = 2 if total_blocks >= 2 else 1
        steps = pl.cdiv(total_blocks, num_chunks)
        has_overhang = (num_chunks * steps) != total_blocks

        valid_rows_in_last = rows - (total_blocks - 1) * block_rows
        if valid_rows_in_last == block_rows:
            valid_rows_in_last = None  # no partial block anywhere -> no mask

        kernel = functools.partial(
            _occ_loss_kernel,
            steps=steps,
            total_blocks=total_blocks,
            groups=block_rows // 8,
            valid_rows_in_last=valid_rows_in_last,
            has_overhang=has_overhang,
        )

        def in_map(p, s):
            # Clamp so the (possible) overhang step of the last chunk re-reads a
            # valid block instead of going out of bounds; its result is skipped.
            return (jnp.minimum(p * steps + s, total_blocks - 1), 0)

        partials = pl.pallas_call(
            kernel,
            out_shape=jax.ShapeDtypeStruct((num_chunks, 8, LANES), jnp.float32),
            grid=(num_chunks, steps),
            in_specs=[
                pl.BlockSpec((block_rows, LANES), in_map),
                pl.BlockSpec((block_rows, LANES), in_map),
            ],
            out_specs=pl.BlockSpec((None, 8, LANES), lambda p, s: (p, 0, 0)),
            compiler_params=pltpu.CompilerParams(
                dimension_semantics=("parallel", "arbitrary"),
                vmem_limit_bytes=32 * 1024 * 1024,
            ),
        )(occ2d, lab2d)

        # Tiny final cross-lane reduce in plain JAX.
        total = total + jnp.sum(partials)

    tail = n - n_aligned
    if tail:
        # <= 127 ragged elements: cheaper to sum in JAX than to pad both arrays.
        xt = flat_occ[n_aligned:].astype(jnp.float32)
        yt = flat_lab[n_aligned:].astype(jnp.float32)
        total = total + jnp.sum(_bce_loss(xt, yt))

    return total * (weight / n)


def _reference(occ, lab, weight):
    loss = -(lab * jnp.log(occ + EPS) + (1.0 - lab) * jnp.log(1.0 - occ + EPS))
    return loss.mean() * weight


if __name__ == "__main__":
    key = jax.random.PRNGKey(0)
    k1, k2 = jax.random.split(key)

    # Small shapes consistent with the module's forward: occupancy predictions in
    # (0,1) and binary occupancy labels, shape (B, C, H, W) = (2, 4, 16, 16).
    occ_ori = jax.random.uniform(k1, (2, 4, 16, 16), jnp.float32, 0.01, 0.99)
    occup_labels_2 = (
        jax.random.uniform(k2, (2, 4, 16, 16), jnp.float32) > 0.5
    ).astype(jnp.float32)

    weight = 2.5  # module __init__ weight, deterministic in-script

    out = occupancy_loss_2(occ_ori, occup_labels_2, weight)
    out = jax.block_until_ready(out)

    ref = _reference(occ_ori, occup_labels_2, weight)
    assert jnp.allclose(out, ref, rtol=1e-5, atol=1e-5), (out, ref)

    print("KERNEL_OK")
</pallas_src>

<mosaic_0001>
module attributes {stable_mosaic.version = 11 : i64} {
  func.func @_occ_loss_kernel(%arg0: i32, %arg1: i32, %arg2: memref<16x128xf32, #tpu.memory_space<vmem>>, %arg3: memref<16x128xf32, #tpu.memory_space<vmem>>, %arg4: memref<1x8x128xf32, #tpu.memory_space<vmem>>) attributes {dimension_semantics = [#tpu.dimension_semantics<parallel>, #tpu.dimension_semantics<arbitrary>], iteration_bounds = array<i64: 1, 1>, scalar_prefetch = 0 : i64, scratch_operands = 0 : i64, tpu.core_type = #tpu.core_type<tc>, window_params = [{transform_indices = @transform_0, window_bounds = array<i64: 16, 128>}, {transform_indices = @transform_1, window_bounds = array<i64: 16, 128>}, {transform_indices = @transform_2, window_bounds = array<i64: 1, 8, 128>}]} {
    %c0_i32 = arith.constant 0 : i32
    %0 = arith.cmpi eq, %arg1, %c0_i32 : i32
    %1 = arith.extui %0 : i1 to i32
    %c0_i32_0 = arith.constant 0 : i32
    %2 = arith.cmpi ne, %1, %c0_i32_0 : i32
    scf.if %2 {
      %cst_13 = arith.constant 0.000000e+00 : f32
      %24 = vector.broadcast %cst_13 : f32 to vector<8x128xf32>
      %c0_14 = arith.constant 0 : index
      %c0_15 = arith.constant 0 : index
      %c0_16 = arith.constant 0 : index
      %25 = vector.load %arg4[%c0_14, %c0_15, %c0_16] : memref<1x8x128xf32, #tpu.memory_space<vmem>>, vector<1x8x128xf32>
      %26 = vector.shape_cast %25 : vector<1x8x128xf32> to vector<8x128xf32>
      %27 = vector.shape_cast %24 : vector<8x128xf32> to vector<1x8x128xf32>
      tpu.vector_store %arg4[%c0_14, %c0_15, %c0_16], %27 {strides = array<i32>} : memref<1x8x128xf32, #tpu.memory_space<vmem>>, vector<1x8x128xf32>,
    } else {
    }
    %c0 = arith.constant 0 : index
    %c0_1 = arith.constant 0 : index
    %3 = vector.load %arg2[%c0, %c0_1] : memref<16x128xf32, #tpu.memory_space<vmem>>, vector<16x128xf32>
    %c0_2 = arith.constant 0 : index
    %c0_3 = arith.constant 0 : index
    %4 = vector.load %arg3[%c0_2, %c0_3] : memref<16x128xf32, #tpu.memory_space<vmem>>, vector<16x128xf32>
    %cst = arith.constant 9.99999974E-6 : f32
    %5 = vector.broadcast %cst : f32 to vector<16x128xf32>
    %6 = arith.addf %3, %5 : vector<16x128xf32>
    %7 = math.log %6 : vector<16x128xf32>
    %cst_4 = arith.constant 1.000010e+00 : f32
    %8 = vector.broadcast %cst_4 : f32 to vector<16x128xf32>
    %9 = arith.subf %8, %3 : vector<16x128xf32>
    %10 = math.log %9 : vector<16x128xf32>
    %11 = arith.subf %7, %10 : vector<16x128xf32>
    %12 = arith.mulf %4, %11 : vector<16x128xf32>
    %13 = arith.addf %10, %12 : vector<16x128xf32>
    %cst_5 = arith.constant 0.000000e+00 : f32
    %14 = vector.broadcast %cst_5 : f32 to vector<16x128xf32>
    %15 = arith.subf %14, %13 : vector<16x128xf32>
    %c0_6 = arith.constant 0 : index
    %c0_7 = arith.constant 0 : index
    %c0_8 = arith.constant 0 : index
    %16 = vector.load %arg4[%c0_6, %c0_7, %c0_8] : memref<1x8x128xf32, #tpu.memory_space<vmem>>, vector<1x8x128xf32>
    %17 = vector.shape_cast %16 : vector<1x8x128xf32> to vector<8x128xf32>
    %18 = vector.shape_cast %15 : vector<16x128xf32> to vector<2x8x128xf32>
    %cst_9 = arith.constant dense<0.000000e+00> : vector<8x128xf32>
    %19 = vector.multi_reduction <add>, %18, %cst_9 [0] : vector<2x8x128xf32> to vector<8x128xf32>
    %20 = arith.addf %17, %19 : vector<8x128xf32>
    %c0_10 = arith.constant 0 : index
    %c0_11 = arith.constant 0 : index
    %c0_12 = arith.constant 0 : index
    %21 = vector.load %arg4[%c0_10, %c0_11, %c0_12] : memref<1x8x128xf32, #tpu.memory_space<vmem>>, vector<1x8x128xf32>
    %22 = vector.shape_cast %21 : vector<1x8x128xf32> to vector<8x128xf32>
    %23 = vector.shape_cast %20 : vector<8x128xf32> to vector<1x8x128xf32>
    tpu.vector_store %arg4[%c0_10, %c0_11, %c0_12], %23 {strides = array<i32>} : memref<1x8x128xf32, #tpu.memory_space<vmem>>, vector<1x8x128xf32>,
    return
  }
  func.func @transform_0(%arg0: i32, %arg1: i32) -> (i32, i32) {
    %c1_i32 = arith.constant 1 : i32
    %0 = arith.muli %arg0, %c1_i32 : i32
    %1 = arith.addi %0, %arg1 : i32
    %c0_i32 = arith.constant 0 : i32
    %2 = arith.minsi %1, %c0_i32 : i32
    %c0_i32_0 = arith.constant 0 : i32
    %c0_i32_1 = arith.constant 0 : i32
    return %2, %c0_i32_0 : i32, i32
  }
  func.func @transform_1(%arg0: i32, %arg1: i32) -> (i32, i32) {
    %c1_i32 = arith.constant 1 : i32
    %0 = arith.muli %arg0, %c1_i32 : i32
    %1 = arith.addi %0, %arg1 : i32
    %c0_i32 = arith.constant 0 : i32
    %2 = arith.minsi %1, %c0_i32 : i32
    %c0_i32_0 = arith.constant 0 : i32
    %c0_i32_1 = arith.constant 0 : i32
    return %2, %c0_i32_0 : i32, i32
  }
  func.func @transform_2(%arg0: i32, %arg1: i32) -> (i32, i32, i32) {
    %c0_i32 = arith.constant 0 : i32
    %c0_i32_0 = arith.constant 0 : i32
    %c0_i32_1 = arith.constant 0 : i32
    return %arg0, %c0_i32, %c0_i32_0 : i32, i32, i32
  }
}

</mosaic_0001>

<bundles_post_ra>
// kernel: tpu_custom_call.1
= control target key start
LH: loop header
LB: loop body
LE: loop exit
PB: predicated region body
PF: predicated region fallthrough
CT: control target
= control target key end

     0   :  { %7 = vsyncpa [#allocation3], 0  ;;  %s255_s0 = inlined_call_operand.hbm [shape: f32[16,128], index: 0, kind: input, shape index: {}]   ;;  %s256_s1 = inlined_call_operand.hbm [shape: f32[16,128], index: 1, kind: input, shape index: {}]   ;;  %s257_s2 = inlined_call_operand.hbm [shape: f32[1,8,128], index: 2, kind: output, shape index: {}]  }
   0x1   :  { %8 = vsyncpa [#allocation6], 0 }
   0x2   :  { %9 = vsyncpa [#allocation4], 0  ;;  %s199_s9 = smov [#allocation2]   ;;  %s127_s13 = scalar_lea.hbm %s255_s0, 256 }
   0x3   :  { %s21_s10 = sshll.u32 %s199_s9, 4  ;;  %p128_p0 = scmp.ne.s32.totalorder %s255_s0, %s127_s13  ;;  %s22_s10 = int_to_ptr.vmem [resolvable:$true] %s21_s10 }
   0x4   :  { %p131_p1 = scmp.lt.u32.totalorder %s127_s13, %s255_s0 }
   0x6   :  { %p133_p2 = pnand %p131_p1, %p128_p0 }
   0x8   :  { %136 = shalt.err (!%p133_p2)
}
   0x9   :  { %s137_s18 = scalar_lea.vmem %s22_s10, 256  ;;  %p142_p4 = scmp.lt.s32.totalorder %s22_s10, %s22_s10 }
   0xa   :  { %p138_p3 = scmp.ne.s32.totalorder %s22_s10, %s137_s18  ;;  %p143_p5 = scmp.lt.s32.totalorder %s137_s18, %s137_s18 }
   0xc   :  { %p144_p6 = por %p143_p5, %p142_p4 }
   0xe   :  { %p145_p7 = pnand %p144_p6, %p138_p3 }
  0x10   :  { %148 = shalt.err (!%p145_p7)
}
  0x11   :  { %s200_s19 = smov 128   ;;  %s201_s20 = smov 8  }
  0x12   :  { %27 = dma.hbm_to_vmem [thread:$0]  %s255_s0, 256, %s22_s10, [#allocation3], %s200_s19, %s200_s19, %s201_s20  }
  0x13   :  { %s202_s23 = smov [#allocation5]   ;;  %s149_s27 = scalar_lea.hbm %s256_s1, 256 }
  0x14   :  { %s39_s24 = sshll.u32 %s202_s23, 4  ;;  %p150_p8 = scmp.ne.s32.totalorder %s256_s1, %s149_s27  ;;  %s40_s24 = int_to_ptr.vmem [resolvable:$true] %s39_s24 }
  0x15   :  { %p153_p9 = scmp.lt.u32.totalorder %s149_s27, %s256_s1 }
  0x17   :  { %p155_p10 = pnand %p153_p9, %p150_p8 }
  0x19   :  { %158 = shalt.err (!%p155_p10)
}
  0x1a   :  { %s159_s4 = scalar_lea.vmem %s40_s24, 256  ;;  %p164_p12 = scmp.lt.s32.totalorder %s40_s24, %s40_s24 }
  0x1b   :  { %p160_p11 = scmp.ne.s32.totalorder %s40_s24, %s159_s4  ;;  %p165_p13 = scmp.lt.s32.totalorder %s159_s4, %s159_s4 }
  0x1d   :  { %p166_p0 = por %p165_p13, %p164_p12 }
  0x1f   :  { %p167_p1 = pnand %p166_p0, %p160_p11 }
  0x21   :  { %170 = shalt.err (!%p167_p1)
}
  0x22   :  { %45 = dma.hbm_to_vmem [thread:$0]  %s256_s1, 256, %s40_s24, [#allocation6], %s200_s19, %s200_s19, %s201_s20  }
  0x23   :  { %193 = dma.done.wait [#allocation3], 256  }
  0x24   :  { %194 = vsyncadd [#allocation3], 4294967040 }
  0x25   :  { %195 = dma.done.wait [#allocation6], 256  }
  0x26   :  { %196 = vsyncadd [#allocation6], 4294967040  ;;  %v65_v0 = vld [vmem:[#allocation2] sm:$0xff]  ;;  %v66_v1 = vld [vmem:[#allocation2 + $0x8] sm:$0xff]  ;;  %s203_s1 = smov [#allocation7]  }
  0x27   :  { %v69_v2 = vadd.f32 1e-05, %v65_v0  ;;  %v70_v3 = vadd.f32 1e-05, %v66_v1  ;;  %v75_v4 = vsub.f32 1.00001, %v65_v0 }
  0x28   :  { %v76_v5 = vsub.f32 1.00001, %v66_v1  ;;  %v67_v13 = vld [vmem:[#allocation5] sm:$0xff]  ;;  %v68_v15 = vld [vmem:[#allocation5 + $0x8] sm:$0xff]  ;;  %s99_s6 = sshll.u32 %s203_s1, 4  ;;  %s100_s6 = int_to_ptr.vmem [resolvable:$true] %s99_s6 }
  0x29   :  { %119 = vlog2.f32 %v69_v2  ;;  %s171_s7 = scalar_lea.vmem %s100_s6, 128  ;;  %p176_p3 = scmp.lt.s32.totalorder %s100_s6, %s100_s6 }
  0x2a   :  { %121 = vlog2.f32 %v70_v3  ;;  %p172_p2 = scmp.ne.s32.totalorder %s100_s6, %s171_s7  ;;  %p177_p4 = scmp.lt.s32.totalorder %s171_s7, %s171_s7 }
  0x2b   :  { %123 = vlog2.f32 %v75_v4 }
  0x2c   :  { %125 = vlog2.f32 %v76_v5  ;;  %p178_p5 = por %p177_p4, %p176_p3 }
  0x2e   :  { %p179_p6 = pnand %p178_p5, %p172_p2 }
  0x33   :  { %v120_v6 = vpop.eup %119 }
  0x34   :  { %v122_v7 = vpop.eup %121  ;;  %v72_v8 = vmul.f32 0.6931472, %v120_v6 }
  0x35   :  { %v124_v9 = vpop.eup %123  ;;  %v74_v10 = vmul.f32 0.6931472, %v122_v7 }
  0x36   :  { %v126_v11 = vpop.eup %125  ;;  %v78_v12 = vmul.f32 0.6931472, %v124_v9 }
  0x37   :  { %v80_v14 = vmul.f32 0.6931472, %v126_v11 }
  0x38   :  { %v81_v16 = vsub.f32 %v72_v8, %v78_v12 }
  0x39   :  { %v82_v17 = vsub.f32 %v74_v10, %v80_v14 }
  0x3a   :  { %v83_v18 = vmul.f32 %v81_v16, %v67_v13 }
  0x3b   :  { %v84_v19 = vmul.f32 %v82_v17, %v68_v15 }
  0x3c   :  { %v85_v20 = vadd.f32 %v83_v18, %v78_v12 }
  0x3d   :  { %v86_v21 = vadd.f32 %v84_v19, %v80_v14 }
  0x3e   :  { %v87_v22 = vsub.f32 0.0, %v85_v20 }
  0x3f   :  { %v88_v23 = vsub.f32 0.0, %v86_v21 }
  0x41   :  { %v90_v24 = vadd.f32 %v88_v23, %v87_v22 }
  0x43   :  { %92 = vst [vmem:[#allocation7] sm:$0xff] %v90_v24 }
  0x44   :  { %182 = shalt.err (!%p179_p6)
}
  0x45   :  { %s183_s10 = scalar_lea.hbm %s257_s2, 128 }
  0x46   :  { %p184_p7 = scmp.ne.s32.totalorder %s257_s2, %s183_s10  ;;  %p187_p8 = scmp.lt.u32.totalorder %s183_s10, %s257_s2 }
  0x48   :  { %p189_p9 = pnand %p187_p8, %p184_p7 }
  0x4a   :  { %192 = shalt.err (!%p189_p9)
}
  0x4b   :  { %102 = dma.vmem_to_hbm [thread:$0]  %s100_s6, 128, %s257_s2, [#allocation4]  }
  0x4c   :  { %197 = dma.done.wait [#allocation4], 128  }
  0x4d   :  { %198 = vsyncadd [#allocation4], 4294967168 }
  0x4e   :  { %106 = vsyncpa [#allocation3], 1 }
  0x4f   :  { %107 = vsyncpa [#allocation6], 1 }
  0x50   :  { %108 = vsyncpa [#allocation4], 1 }

</bundles_post_ra>
